<compile_context>
chip_gen: v7x
topology: tpu7x:2x2x1
jax: 0.10.0
libtpu: 0.0.40
codegen_flags: <defaults>
</compile_context>

<pallas_src>
import functools

import jax
import jax.numpy as jnp
from jax.experimental import pallas as pl
from jax.experimental.pallas import tpu as pltpu

# Hyperparameters (module defaults).
CE = 1.0
S = 8.0
M = 0.2
# quan == 0 -> quantization terms are exactly zero; code_logits is unused.


def _round_up(x, n):
    return ((x + n - 1) // n) * n


def orthohash_kernel(logits_ref, labels_ref, loss_batch_ref):
    # logits_ref: (TB, C) float   labels_ref: (TB, 1) int32
    x = logits_ref[...].astype(jnp.float32)                       # (TB, C)
    lbl = labels_ref[...]                                         # (TB, 1)
    tb, c = x.shape

    class_ids = jax.lax.broadcasted_iota(jnp.int32, (tb, c), 1)   # (TB, C)
    is_tgt = class_ids == lbl                                     # (TB, C) bool

    # margin = S * logits - S*M at the target class (cos margin, not multiclass)
    sx = S * x
    margin = jnp.where(is_tgt, sx - (S * M), sx)                  # (TB, C)

    # Stable per-row cross entropy: logsumexp(margin) - margin[label]
    m_max = jnp.max(margin, axis=1, keepdims=True)                # (TB, 1)
    sumexp = jnp.sum(jnp.exp(margin - m_max), axis=1, keepdims=True)
    lse = jnp.log(sumexp) + m_max                                 # (TB, 1)
    tgt = jnp.sum(jnp.where(is_tgt, margin, 0.0), axis=1, keepdims=True)

    # quan == 0 -> loss_batch = CE * loss_ce_batch
    loss_batch_ref[...] = CE * (lse - tgt)                        # (TB, 1)


@functools.partial(jax.jit, static_argnames=("tb",))
def orthohash_loss(logits, labels_onehot, code_logits=None, *, tb=512):
    """Forward pass of OrthoHashLoss (default config). Returns (loss, loss_batch)."""
    del code_logits  # unused when quan == 0: never DMA'd, never read.
    B, C = logits.shape

    # PyTorch: labels = labels.argmax(1)  (onehot=True path)
    labels_idx = jnp.argmax(labels_onehot, axis=1).astype(jnp.int32)

    # --- batch tile size: big enough to pipeline, small enough for VMEM ----
    tb = min(tb, _round_up(B, 8))
    # keep one logits buffer <= ~4 MiB so double-buffering stays well under
    # the scoped-VMEM budget on every generation (v5e 16 MiB default scoped,
    # v7x 64 MiB physical).
    tb_vmem_cap = max(8, ((4 * 1024 * 1024) // (C * 4)) // 8 * 8)
    tb = max(8, min(tb, tb_vmem_cap))

    grid_b = pl.cdiv(B, tb)
    b_pad = grid_b * tb
    if b_pad != B:
        logits = jnp.pad(logits, ((0, b_pad - B), (0, 0)))
        labels_idx = jnp.pad(labels_idx, (0, b_pad - B))
    labels_2d = labels_idx.reshape(b_pad, 1)

    loss_batch_pad = pl.pallas_call(
        orthohash_kernel,
        out_shape=jax.ShapeDtypeStruct((b_pad, 1), jnp.float32),
        grid=(grid_b,),
        in_specs=[
            pl.BlockSpec((tb, C), lambda i: (i, 0)),   # logits tile
            pl.BlockSpec((tb, 1), lambda i: (i, 0)),   # int32 label indices
        ],
        out_specs=pl.BlockSpec((tb, 1), lambda i: (i, 0)),
        compiler_params=pltpu.CompilerParams(
            dimension_semantics=("parallel",),
            vmem_limit_bytes=32 * 1024 * 1024,
        ),
    )(logits, labels_2d)

    # Drop padded rows; global mean is essentially free in the wrapper.
    loss_batch = loss_batch_pad[:B, 0]
    loss = jnp.mean(loss_batch)   # == CE*mean(loss_ce_batch) + quan*0
    return loss, loss_batch


def orthohash_loss_ref(logits, labels_onehot, code_logits=None):
    # Pure-JAX reference of the same (default-config) forward.
    labels_idx = jnp.argmax(labels_onehot, axis=1)
    y = jax.nn.one_hot(labels_idx, logits.shape[1], dtype=jnp.float32)
    margin = S * (logits.astype(jnp.float32) - M * y)
    lse = jax.scipy.special.logsumexp(margin, axis=1)
    tgt = jnp.take_along_axis(margin, labels_idx[:, None], axis=1)[:, 0]
    loss_batch = CE * (lse - tgt)
    return jnp.mean(loss_batch), loss_batch


if __name__ == "__main__":
    key = jax.random.PRNGKey(0)

    # Test 1: small aligned shapes (B=8, C=16, K=32 hash bits).
    B, C, K = 8, 16, 32
    k1, k2, k3 = jax.random.split(key, 3)
    logits = jnp.tanh(jax.random.normal(k1, (B, C), dtype=jnp.float32))
    labels_idx = jax.random.randint(k2, (B,), 0, C)
    labels_onehot = jax.nn.one_hot(labels_idx, C, dtype=jnp.float32)
    code_logits = jax.random.normal(k3, (B, K), dtype=jnp.float32)

    loss, loss_batch = orthohash_loss(logits, labels_onehot, code_logits)
    jax.block_until_ready((loss, loss_batch))
    loss_r, loss_batch_r = orthohash_loss_ref(logits, labels_onehot, code_logits)
    assert jnp.allclose(loss, loss_r, atol=1e-5), (loss, loss_r)
    assert jnp.allclose(loss_batch, loss_batch_r, atol=1e-5)

    # Test 2: batch not a multiple of the tile (exercises padding/masking).
    B2, C2 = 13, 10
    k4, k5 = jax.random.split(k3)
    logits2 = jnp.tanh(jax.random.normal(k4, (B2, C2), dtype=jnp.float32))
    labels2 = jax.nn.one_hot(jax.random.randint(k5, (B2,), 0, C2), C2,
                             dtype=jnp.float32)
    loss2, loss_batch2 = orthohash_loss(logits2, labels2)
    jax.block_until_ready((loss2, loss_batch2))
    loss2_r, loss_batch2_r = orthohash_loss_ref(logits2, labels2)
    assert jnp.allclose(loss2, loss2_r, atol=1e-5), (loss2, loss2_r)
    assert jnp.allclose(loss_batch2, loss_batch2_r, atol=1e-5)

    print("KERNEL_OK")
</pallas_src>

<mosaic_0001>
module attributes {stable_mosaic.version = 11 : i64} {
  func.func @orthohash_kernel(%arg0: i32, %arg1: memref<8x16xf32, #tpu.memory_space<vmem>>, %arg2: memref<8x1xi32, #tpu.memory_space<vmem>>, %arg3: memref<8x1xf32, #tpu.memory_space<vmem>>) attributes {dimension_semantics = [#tpu.dimension_semantics<parallel>], iteration_bounds = array<i64: 1>, scalar_prefetch = 0 : i64, scratch_operands = 0 : i64, tpu.core_type = #tpu.core_type<tc>, window_params = [{transform_indices = @transform_0, window_bounds = array<i64: 8, 16>}, {transform_indices = @transform_1, window_bounds = array<i64: 8, 1>}, {transform_indices = @transform_2, window_bounds = array<i64: 8, 1>}]} {
    %c0 = arith.constant 0 : index
    %c0_0 = arith.constant 0 : index
    %0 = vector.load %arg1[%c0, %c0_0] : memref<8x16xf32, #tpu.memory_space<vmem>>, vector<8x16xf32>
    %c0_1 = arith.constant 0 : index
    %c0_2 = arith.constant 0 : index
    %1 = vector.load %arg2[%c0_1, %c0_2] : memref<8x1xi32, #tpu.memory_space<vmem>>, vector<8x1xi32>
    %2 = tpu.iota {dimensions = array<i32: 1>} : vector<8x16xi32>
    %3 = vector.broadcast %1 : vector<8x1xi32> to vector<8x16xi32>
    %4 = arith.cmpi eq, %2, %3 : vector<8x16xi32>
    %cst = arith.constant 8.000000e+00 : f32
    %5 = vector.broadcast %cst : f32 to vector<8x16xf32>
    %6 = arith.mulf %5, %0 : vector<8x16xf32>
    %cst_3 = arith.constant 1.600000e+00 : f32
    %7 = vector.broadcast %cst_3 : f32 to vector<8x16xf32>
    %8 = arith.subf %6, %7 : vector<8x16xf32>
    %9 = arith.select %4, %8, %6 : vector<8x16xi1>, vector<8x16xf32>
    %cst_4 = arith.constant dense<0xFF800000> : vector<8xf32>
    %10 = vector.multi_reduction <maximumf>, %9, %cst_4 [1] : vector<8x16xf32> to vector<8xf32>
    %11 = vector.shape_cast %10 : vector<8xf32> to vector<8x1xf32>
    %12 = vector.broadcast %11 : vector<8x1xf32> to vector<8x16xf32>
    %13 = arith.subf %9, %12 : vector<8x16xf32>
    %14 = math.exp %13 : vector<8x16xf32>
    %cst_5 = arith.constant dense<0.000000e+00> : vector<8xf32>
    %15 = vector.multi_reduction <add>, %14, %cst_5 [1] : vector<8x16xf32> to vector<8xf32>
    %16 = vector.shape_cast %15 : vector<8xf32> to vector<8x1xf32>
    %17 = math.log %16 : vector<8x1xf32>
    %18 = arith.addf %17, %11 : vector<8x1xf32>
    %cst_6 = arith.constant 0.000000e+00 : f32
    %19 = vector.broadcast %cst_6 : f32 to vector<8x16xf32>
    %20 = arith.select %4, %9, %19 : vector<8x16xi1>, vector<8x16xf32>
    %cst_7 = arith.constant dense<0.000000e+00> : vector<8xf32>
    %21 = vector.multi_reduction <add>, %20, %cst_7 [1] : vector<8x16xf32> to vector<8xf32>
    %22 = vector.shape_cast %21 : vector<8xf32> to vector<8x1xf32>
    %23 = arith.subf %18, %22 : vector<8x1xf32>
    %cst_8 = arith.constant 1.000000e+00 : f32
    %24 = vector.broadcast %cst_8 : f32 to vector<8x1xf32>
    %25 = arith.mulf %24, %23 : vector<8x1xf32>
    %c0_9 = arith.constant 0 : index
    %c0_10 = arith.constant 0 : index
    %26 = vector.load %arg3[%c0_9, %c0_10] : memref<8x1xf32, #tpu.memory_space<vmem>>, vector<8x1xf32>
    tpu.vector_store %arg3[%c0_9, %c0_10], %25 {strides = array<i32>} : memref<8x1xf32, #tpu.memory_space<vmem>>, vector<8x1xf32>,
    return
  }
  func.func @transform_0(%arg0: i32) -> (i32, i32) {
    %c0_i32 = arith.constant 0 : i32
    %c0_i32_0 = arith.constant 0 : i32
    return %arg0, %c0_i32 : i32, i32
  }
  func.func @transform_1(%arg0: i32) -> (i32, i32) {
    %c0_i32 = arith.constant 0 : i32
    %c0_i32_0 = arith.constant 0 : i32
    return %arg0, %c0_i32 : i32, i32
  }
  func.func @transform_2(%arg0: i32) -> (i32, i32) {
    %c0_i32 = arith.constant 0 : i32
    %c0_i32_0 = arith.constant 0 : i32
    return %arg0, %c0_i32 : i32, i32
  }
}

</mosaic_0001>

<bundles_post_ra>
// kernel: orthohash_loss.1
= control target key start
LH: loop header
LB: loop body
LE: loop exit
PB: predicated region body
PF: predicated region fallthrough
CT: control target
= control target key end

     0   :  { %v53_v0 = vmov 0   ;;  %v13_v3 = vlaneseq  ;;  %vm22_vm0 = vcmask 130048   ;;  %vm40_vm2 = vcmask 7168   ;;  %s78_s1 = inlined_call_operand.vmem [shape: s32[8,1], index: 1, kind: input, shape index: {}]   ;;  %s79_s0 = inlined_call_operand.vmem [shape: f32[8,16], index: 0, kind: input, shape index: {}]   ;;  %s80_s2 = inlined_call_operand.vmem [shape: f32[8,1], index: 2, kind: output, shape index: {}]  }
   0x1   :  { %48 = vset.pattern.permute.xlu0 %v53_v0  ;;  %v12_v1 = vld [vmem:[%s78_s1] sm:$0xff] }
   0x2   :  { %16 = vperm.xlu0 %48, %v12_v1   ;;  %v11_v2 = vld [vmem:[%s79_s0] sm:$0xff]  ;;  %v14_v5 = vand.u32 127, %v13_v3 }
   0x3   :  { %v19_v4 = vmul.f32 8.0, %v11_v2 }
   0x5   :  { %v46_v6 = vadd.f32 -1.6, %v19_v4 }
  0x81   :  { %v17_v7 = vpop.permute.xlu0 %16 }
  0x82   :  { %vm18_vm1 = vcmp.eq.s32.totalorder %v14_v5, %v17_v7 }
  0x83   :  { %v21_v8 = vsel %vm18_vm1, %v46_v6, %v19_v4  ;;  %v35_v9 = vsel %vm18_vm1, %v46_v6, 0.0 }
  0x84   :  { %v23_v10 = vsel %vm22_vm0, %v21_v8, -inf  ;;  %v36_v16 = vsel %vm22_vm0, %v35_v9, 0.0 }
  0x85   :  { %24 = vmax.xlane.f32.xlu0 %v23_v10 }
 0x112   :  { %v25_v11 = vpop.xlane.xlu0 %24 }
 0x113   :  { %v26_v12 = vsub.f32 %v21_v8, %v25_v11 }
 0x115   :  { %v27_v13 = vmul.f32 1.442695, %v26_v12 }
 0x117   :  { %49 = vpow2.f32 %v27_v13 }
 0x121   :  { %v50_v14 = vpop.eup %49 }
 0x122   :  { %v29_v15 = vsel %vm22_vm0, %v50_v14, 0.0 }
 0x123   :  { %30 = vadd.xlane.f32.xlu1 %v29_v15 }
 0x127   :  { %37 = vadd.xlane.f32.xlu1 %v36_v16 }
 0x1b0   :  { %v31_v17 = vpop.xlane.xlu1 %30 }
 0x1b1   :  { %51 = vlog2.f32 %v31_v17 }
 0x1b4   :  { %v38_v21 = vpop.xlane.xlu1 %37 }
 0x1bb   :  { %v52_v18 = vpop.eup %51 }
 0x1bc   :  { %v33_v19 = vmul.f32 0.6931472, %v52_v18 }
 0x1be   :  { %v34_v20 = vadd.f32 %v33_v19, %v25_v11 }
 0x1c0   :  { %v39_v22 = vsub.f32 %v34_v20, %v38_v21 }
 0x1c2   :  { %41 = vst.msk [vmem:[%s80_s2] sm:$0xff] %vm40_vm2, %v39_v22 }

</bundles_post_ra>
